<compile_context>
chip_gen: v5e
topology: v5e:2x2
jax: 0.10.0
libtpu: 0.0.40
codegen_flags: <defaults>
</compile_context>

<pallas_src>
import jax
import jax.numpy as jnp
from jax import lax
from jax.experimental import pallas as pl
from jax.experimental.pallas import tpu as pltpu


# ----------------------------- model dims ----------------------------------
B = 2            # batch
T = 8            # sequence length
D_SEQ = 16       # input_dim_seq
H = 32           # hidden_dim
NUM_LAYERS = 2   # num_layers (kernel below is written for exactly 2 layers)
D_STATIC = 8     # input_dim_static
STATIC_H = 32    # fc_static hidden (fixed to 32 in the module)
FINAL_H = 64     # fc_final hidden (fixed to 64 in the module)
OUT_DIM = 4      # output_dim

SIG_SCALE = 0.5  # sigmoid(a) = 0.5*tanh(0.5*a) + 0.5; the 0.5*a is baked into
                 # the sigmoid-gate weight/bias columns at param-prep time.

# Combined gate-slab column layout (width 8H), shared by w_ext, b_ext, w_blk:
#   [ i0 | i1 | f0 | f1 | o0 | o1 | g0 | g1 ]
# so after activation, i/f/o/g slices are already stacked [layer0 | layer1]
# and the whole LSTM cell update runs on stacked (B, 2H) state vectors.


# ------------------------------- kernel -------------------------------------
def _kernel(
    # inputs
    x_seq_ref,      # (T, B, D_SEQ)  time-major sequence input
    x_static_ref,   # (B, D_STATIC)
    wext_ref,       # (D_SEQ, 8H)  layer-0 input projection into the combined slab
    bext_ref,       # (1, 8H)      combined bias (b0 in layer-0 cols, b1 in layer-1 cols)
    wblk_ref,       # (2H, 8H)     wavefront block weight [[whh0, wih1],[0, whh1]]
    ws_ref,         # (D_STATIC, STATIC_H)
    bs_ref,         # (1, STATIC_H)
    wf1_seq_ref,    # (H, FINAL_H)        first fc_final linear, lstm part
    wf1_stat_ref,   # (STATIC_H, FINAL_H) first fc_final linear, static part
    bf1_ref,        # (1, FINAL_H)
    wf2_ref,        # (FINAL_H, OUT_DIM)
    bf2_ref,        # (1, OUT_DIM)
    # outputs
    out_ref,        # (B, OUT_DIM)
):
    wblk = wblk_ref[...]
    bext = bext_ref[...]
    G2 = 2 * H      # stacked state width
    G8 = 8 * H      # combined gate slab width

    # ---- hoisted layer-0 input projection: ONE batched matmul, off the chain.
    # Rows are t*B + b (time-major), so gin[s] below is a full contiguous tile.
    x_flat = x_seq_ref[...].reshape(T * B, D_SEQ)
    gin = (
        jnp.dot(x_flat, wext_ref[...], preferred_element_type=jnp.float32)
        + bext
    ).reshape(T, B, G8)

    def fused_cell(slab, c_st):
        # Sigmoid-gate columns were pre-scaled by 0.5, so one tanh over the
        # whole slab (single EUP push) gives both sigmoid and tanh gates.
        t = jnp.tanh(slab)
        sig = 0.5 * t[:, : 6 * H] + 0.5          # = sigmoid(original preact)
        i_st = sig[:, 0:G2]                      # [i0 | i1]
        f_st = sig[:, G2:2 * G2]                 # [f0 | f1]
        o_st = sig[:, 2 * G2:3 * G2]             # [o0 | o1]
        g_st = t[:, 6 * H:]                      # [g0 | g1]
        c_new = f_st * c_st + i_st * g_st
        h_new = o_st * jnp.tanh(c_new)
        return h_new, c_new

    # Stacked-state layout: lanes [0:H] = layer 0, [H:2H] = layer 1.
    lane = lax.broadcasted_iota(jnp.int32, (1, G2), 1)
    l0_mask = (lane < H).astype(jnp.float32)

    # ---- super-step 0: layer-0 step 0 only (all recurrent inputs are zero) --
    h_st, c_st = fused_cell(gin[0], jnp.zeros((B, G2), jnp.float32))
    h_st = h_st * l0_mask                        # layer-1 state stays zero
    c_st = c_st * l0_mask

    # ---- super-steps 1..T-1 (wavefront): ONE matmul + ONE fused cell each.
    # After step s: h_st = [h0_s | h1_{s-1}], c_st = [c0_s | c1_{s-1}].
    # (LSTM inter-layer dropout is identity in eval mode.)
    for s in range(1, T):
        slab = gin[s] + jnp.dot(h_st, wblk, preferred_element_type=jnp.float32)
        h_st, c_st = fused_cell(slab, c_st)

    # ---- super-step T: layer-1 step T-1 only (layer-0 half is discarded) ----
    slab = bext + jnp.dot(h_st, wblk, preferred_element_type=jnp.float32)
    h_st, _ = fused_cell(slab, c_st)
    h_last = h_st[:, H:G2]                       # == lstm_out[:, -1, :]

    # ---- fc_static: Linear + ReLU (dropout is identity in eval mode) --------
    static_out = jnp.maximum(
        jnp.dot(x_static_ref[...], ws_ref[...],
                preferred_element_type=jnp.float32) + bs_ref[...],
        0.0,
    )                                            # (B, STATIC_H)

    # ---- fc_final on concat([h_last, static_out]) as a split matmul ---------
    hidden = jnp.maximum(
        jnp.dot(h_last, wf1_seq_ref[...], preferred_element_type=jnp.float32)
        + jnp.dot(static_out, wf1_stat_ref[...],
                  preferred_element_type=jnp.float32)
        + bf1_ref[...],
        0.0,
    )                                            # (B, FINAL_H)

    out = (
        jnp.dot(hidden, wf2_ref[...], preferred_element_type=jnp.float32)
        + bf2_ref[...]
    )                                            # (B, OUT_DIM)
    out_ref[...] = out.astype(out_ref.dtype)


def lstm_with_tabular(x_seq, x_static, kernel_params):
    """x_seq: (B, T, D_SEQ) batch_first (PyTorch convention), x_static: (B, D_STATIC)."""
    # One-time layout prep in XLA: time-major so every per-step gate read inside
    # the kernel is a full, sublane-contiguous tile (no cross-sublane gather).
    x_seq_tm = jnp.transpose(x_seq, (1, 0, 2))   # (T, B, D_SEQ)
    inputs = (x_seq_tm, x_static) + tuple(kernel_params)
    vmem_spec = pl.BlockSpec(memory_space=pltpu.MemorySpace.VMEM)

    # TODO(synk): when the caller can batch B up to >=8 (fills the f32 sublanes),
    # add a leading batch grid axis + dimension_semantics=("parallel",) so v7x's
    # second TensorCore takes half the batch; at this footprint no tiling/VMEM
    # tuning is needed.
    return pl.pallas_call(
        _kernel,
        out_shape=jax.ShapeDtypeStruct((B, OUT_DIM), jnp.float32),
        in_specs=[vmem_spec] * len(inputs),
        out_specs=vmem_spec,
    )(*inputs)


# ----------------------------- param init ----------------------------------
def init_params(key):
    """PyTorch-layout params (gate order i,f,g,o; weights (out, in))."""
    ks = iter(jax.random.split(key, 14))

    def u(k, shape, bound):
        return jax.random.uniform(k, shape, jnp.float32, -bound, bound)

    bd = 1.0 / jnp.sqrt(H)
    p = {}
    # LSTM layer 0 (input D_SEQ)
    p["w_ih_l0"] = u(next(ks), (4 * H, D_SEQ), bd)
    p["w_hh_l0"] = u(next(ks), (4 * H, H), bd)
    p["b_ih_l0"] = u(next(ks), (4 * H,), bd)
    p["b_hh_l0"] = u(next(ks), (4 * H,), bd)
    # LSTM layer 1 (input H)
    p["w_ih_l1"] = u(next(ks), (4 * H, H), bd)
    p["w_hh_l1"] = u(next(ks), (4 * H, H), bd)
    p["b_ih_l1"] = u(next(ks), (4 * H,), bd)
    p["b_hh_l1"] = u(next(ks), (4 * H,), bd)
    # fc_static: Linear(D_STATIC, 32)
    sb = 1.0 / jnp.sqrt(D_STATIC)
    p["w_static"] = u(next(ks), (STATIC_H, D_STATIC), sb)
    p["b_static"] = u(next(ks), (STATIC_H,), sb)
    # fc_final[0]: Linear(H + 32, 64)
    f1b = 1.0 / jnp.sqrt(H + STATIC_H)
    p["w_final1"] = u(next(ks), (FINAL_H, H + STATIC_H), f1b)
    p["b_final1"] = u(next(ks), (FINAL_H,), f1b)
    # fc_final[2]: Linear(64, OUT_DIM)
    f2b = 1.0 / jnp.sqrt(FINAL_H)
    p["w_final2"] = u(next(ks), (OUT_DIM, FINAL_H), f2b)
    p["b_final2"] = u(next(ks), (OUT_DIM,), f2b)
    return p


def _split_gates_cols(w_pt):
    """PyTorch (4H, Din) weight -> dict of (Din, H) column blocks per gate."""
    wt = w_pt.T                                   # (Din, 4H), cols ordered i,f,g,o
    return {"i": wt[:, 0:H], "f": wt[:, H:2 * H],
            "g": wt[:, 2 * H:3 * H], "o": wt[:, 3 * H:4 * H]}


def _split_gates_bias(b):
    return {"i": b[0:H], "f": b[H:2 * H], "g": b[2 * H:3 * H], "o": b[3 * H:4 * H]}


def _combine_cols(i0, i1, f0, f1, o0, o1, g0, g1):
    """Assemble the combined 8H slab columns; sigmoid-gate cols pre-scaled by 0.5."""
    parts = [SIG_SCALE * i0, SIG_SCALE * i1, SIG_SCALE * f0, SIG_SCALE * f1,
             SIG_SCALE * o0, SIG_SCALE * o1, g0, g1]
    return jnp.concatenate(parts, axis=-1)


def prepare_params(p):
    """One-time preprocessing: build the wavefront block weights (see layout above)."""
    wih0 = _split_gates_cols(p["w_ih_l0"])        # (D_SEQ, H) each
    whh0 = _split_gates_cols(p["w_hh_l0"])        # (H, H) each
    wih1 = _split_gates_cols(p["w_ih_l1"])        # (H, H) each
    whh1 = _split_gates_cols(p["w_hh_l1"])        # (H, H) each
    b0 = _split_gates_bias(p["b_ih_l0"] + p["b_hh_l0"])
    b1 = _split_gates_bias(p["b_ih_l1"] + p["b_hh_l1"])

    zD = jnp.zeros((D_SEQ, H), jnp.float32)
    zH = jnp.zeros((H, H), jnp.float32)

    # Extended input projection: x_t only feeds layer-0 gate columns.
    w_ext = _combine_cols(wih0["i"], zD, wih0["f"], zD, wih0["o"], zD, wih0["g"], zD)
    # Combined bias: layer-0 cols get (b_ih0+b_hh0), layer-1 cols get (b_ih1+b_hh1).
    b_ext = _combine_cols(b0["i"], b1["i"], b0["f"], b1["f"],
                          b0["o"], b1["o"], b0["g"], b1["g"]).reshape(1, 8 * H)

    # Wavefront block weight: rows [h0 ; h1] -> combined gate columns.
    w_blk_h0 = _combine_cols(whh0["i"], wih1["i"], whh0["f"], wih1["f"],
                             whh0["o"], wih1["o"], whh0["g"], wih1["g"])
    w_blk_h1 = _combine_cols(zH, whh1["i"], zH, whh1["f"], zH, whh1["o"],
                             zH, whh1["g"])
    w_blk = jnp.concatenate([w_blk_h0, w_blk_h1], axis=0)      # (2H, 8H)

    ws = p["w_static"].T                                        # (D_STATIC, 32)
    bs = p["b_static"].reshape(1, STATIC_H)

    wf1 = p["w_final1"].T                                       # (H+32, 64)
    wf1_seq = wf1[:H, :]                                        # (H, 64)
    wf1_stat = wf1[H:, :]                                       # (32, 64)
    bf1 = p["b_final1"].reshape(1, FINAL_H)

    wf2 = p["w_final2"].T                                       # (64, OUT_DIM)
    bf2 = p["b_final2"].reshape(1, OUT_DIM)

    return (w_ext, b_ext, w_blk, ws, bs, wf1_seq, wf1_stat, bf1, wf2, bf2)


# ----------------------------- pure-JAX reference ---------------------------
def reference(x_seq, x_static, p):
    """Independent reference in PyTorch convention from raw (unprepared) params."""
    def lstm_layer(xs, w_ih, w_hh, b_ih, b_hh):   # xs: (T, B, Din)
        def step(carry, x_t):
            h, c = carry
            gates = x_t @ w_ih.T + b_ih + h @ w_hh.T + b_hh
            i = jax.nn.sigmoid(gates[:, 0 * H:1 * H])
            f = jax.nn.sigmoid(gates[:, 1 * H:2 * H])
            g = jnp.tanh(gates[:, 2 * H:3 * H])
            o = jax.nn.sigmoid(gates[:, 3 * H:4 * H])
            c = f * c + i * g
            h = o * jnp.tanh(c)
            return (h, c), h
        init = (jnp.zeros((B, H), jnp.float32), jnp.zeros((B, H), jnp.float32))
        _, hs = lax.scan(step, init, xs)
        return hs                                  # (T, B, H)

    xs = jnp.transpose(x_seq, (1, 0, 2))           # (T, B, D_SEQ)
    hs0 = lstm_layer(xs, p["w_ih_l0"], p["w_hh_l0"], p["b_ih_l0"], p["b_hh_l0"])
    hs1 = lstm_layer(hs0, p["w_ih_l1"], p["w_hh_l1"], p["b_ih_l1"], p["b_hh_l1"])
    h_last = hs1[-1]                               # (B, H)

    static_out = jnp.maximum(x_static @ p["w_static"].T + p["b_static"], 0.0)
    combined = jnp.concatenate([h_last, static_out], axis=1)
    hidden = jnp.maximum(combined @ p["w_final1"].T + p["b_final1"], 0.0)
    return hidden @ p["w_final2"].T + p["b_final2"]


if __name__ == "__main__":
    key = jax.random.PRNGKey(0)
    k_seq, k_stat, k_params = jax.random.split(key, 3)

    x_seq = jax.random.normal(k_seq, (B, T, D_SEQ), jnp.float32)
    x_static = jax.random.normal(k_stat, (B, D_STATIC), jnp.float32)

    raw_params = init_params(k_params)
    kernel_params = prepare_params(raw_params)     # one-time layout prep

    out = lstm_with_tabular(x_seq, x_static, kernel_params)
    out = jax.block_until_ready(out)

    ref = reference(x_seq, x_static, raw_params)
    assert out.shape == (B, OUT_DIM)
    assert jnp.allclose(out, ref, atol=5e-4, rtol=5e-4), (out, ref)

    print("KERNEL_OK")
</pallas_src>

<mosaic_0001>
module attributes {stable_mosaic.version = 11 : i64} {
  func.func @_kernel(%arg0: memref<8x2x16xf32, #tpu.memory_space<vmem>>, %arg1: memref<2x8xf32, #tpu.memory_space<vmem>>, %arg2: memref<16x256xf32, #tpu.memory_space<vmem>>, %arg3: memref<1x256xf32, #tpu.memory_space<vmem>>, %arg4: memref<64x256xf32, #tpu.memory_space<vmem>>, %arg5: memref<8x32xf32, #tpu.memory_space<vmem>>, %arg6: memref<1x32xf32, #tpu.memory_space<vmem>>, %arg7: memref<32x64xf32, #tpu.memory_space<vmem>>, %arg8: memref<32x64xf32, #tpu.memory_space<vmem>>, %arg9: memref<1x64xf32, #tpu.memory_space<vmem>>, %arg10: memref<64x4xf32, #tpu.memory_space<vmem>>, %arg11: memref<1x4xf32, #tpu.memory_space<vmem>>, %arg12: memref<2x4xf32, #tpu.memory_space<vmem>>) attributes {dimension_semantics = [], scalar_prefetch = 0 : i64, scratch_operands = 0 : i64, tpu.core_type = #tpu.core_type<tc>} {
    %c0 = arith.constant 0 : index
    %c0_0 = arith.constant 0 : index
    %0 = vector.load %arg4[%c0, %c0_0] : memref<64x256xf32, #tpu.memory_space<vmem>>, vector<64x256xf32>
    %c0_1 = arith.constant 0 : index
    %c0_2 = arith.constant 0 : index
    %1 = vector.load %arg3[%c0_1, %c0_2] : memref<1x256xf32, #tpu.memory_space<vmem>>, vector<1x256xf32>
    %c0_3 = arith.constant 0 : index
    %c0_4 = arith.constant 0 : index
    %c0_5 = arith.constant 0 : index
    %2 = vector.load %arg0[%c0_3, %c0_4, %c0_5] : memref<8x2x16xf32, #tpu.memory_space<vmem>>, vector<8x2x16xf32>
    %3 = vector.shape_cast %2 : vector<8x2x16xf32> to vector<16x16xf32>
    %c0_6 = arith.constant 0 : index
    %c0_7 = arith.constant 0 : index
    %4 = vector.load %arg2[%c0_6, %c0_7] : memref<16x256xf32, #tpu.memory_space<vmem>>, vector<16x256xf32>
    %cst = arith.constant dense<0.000000e+00> : vector<16x256xf32>
    %5 = tpu.matmul %3, %4, %cst {dimension_numbers = #tpu.dot_dimension_numbers<[1], [0], [0], [1], [0, 0, 1, 1], [], []>} : vector<16x16xf32>, vector<16x256xf32>, vector<16x256xf32> -> vector<16x256xf32>
    %6 = vector.broadcast %1 : vector<1x256xf32> to vector<16x256xf32>
    %7 = arith.addf %5, %6 : vector<16x256xf32>
    %8 = vector.shape_cast %7 : vector<16x256xf32> to vector<8x2x256xf32>
    %9 = tpu.iota {dimensions = array<i32: 1>} : vector<1x64xi32>
    %c32_i32 = arith.constant 32 : i32
    %10 = vector.broadcast %c32_i32 : i32 to vector<1x64xi32>
    %11 = arith.cmpi slt, %9, %10 : vector<1x64xi32>
    %12 = arith.extui %11 : vector<1x64xi1> to vector<1x64xi32>
    %13 = arith.sitofp %12 : vector<1x64xi32> to vector<1x64xf32>
    %14 = vector.extract_strided_slice %8 {offsets = [0, 0, 0], sizes = [1, 2, 256], strides = [1, 1, 1]} : vector<8x2x256xf32> to vector<1x2x256xf32>
    %15 = vector.shape_cast %14 : vector<1x2x256xf32> to vector<2x256xf32>
    %cst_8 = arith.constant 0.000000e+00 : f32
    %16 = vector.broadcast %cst_8 : f32 to vector<2x64xf32>
    %17 = math.tanh %15 : vector<2x256xf32>
    %18 = vector.extract_strided_slice %17 {offsets = [0, 0], sizes = [2, 192], strides = [1, 1]} : vector<2x256xf32> to vector<2x192xf32>
    %cst_9 = arith.constant 5.000000e-01 : f32
    %19 = vector.broadcast %cst_9 : f32 to vector<2x192xf32>
    %20 = arith.mulf %19, %18 : vector<2x192xf32>
    %cst_10 = arith.constant 5.000000e-01 : f32
    %21 = vector.broadcast %cst_10 : f32 to vector<2x192xf32>
    %22 = arith.addf %20, %21 : vector<2x192xf32>
    %23 = vector.extract_strided_slice %22 {offsets = [0, 0], sizes = [2, 64], strides = [1, 1]} : vector<2x192xf32> to vector<2x64xf32>
    %24 = vector.extract_strided_slice %22 {offsets = [0, 64], sizes = [2, 64], strides = [1, 1]} : vector<2x192xf32> to vector<2x64xf32>
    %25 = vector.extract_strided_slice %22 {offsets = [0, 128], sizes = [2, 64], strides = [1, 1]} : vector<2x192xf32> to vector<2x64xf32>
    %26 = vector.extract_strided_slice %17 {offsets = [0, 192], sizes = [2, 64], strides = [1, 1]} : vector<2x256xf32> to vector<2x64xf32>
    %27 = arith.mulf %24, %16 : vector<2x64xf32>
    %28 = arith.mulf %23, %26 : vector<2x64xf32>
    %29 = arith.addf %27, %28 : vector<2x64xf32>
    %30 = math.tanh %29 : vector<2x64xf32>
    %31 = arith.mulf %25, %30 : vector<2x64xf32>
    %32 = vector.broadcast %13 : vector<1x64xf32> to vector<2x64xf32>
    %33 = arith.mulf %31, %32 : vector<2x64xf32>
    %34 = vector.broadcast %13 : vector<1x64xf32> to vector<2x64xf32>
    %35 = arith.mulf %29, %34 : vector<2x64xf32>
    %36 = vector.extract_strided_slice %8 {offsets = [1, 0, 0], sizes = [1, 2, 256], strides = [1, 1, 1]} : vector<8x2x256xf32> to vector<1x2x256xf32>
    %37 = vector.shape_cast %36 : vector<1x2x256xf32> to vector<2x256xf32>
    %cst_11 = arith.constant dense<0.000000e+00> : vector<2x256xf32>
    %38 = tpu.matmul %33, %0, %cst_11 {dimension_numbers = #tpu.dot_dimension_numbers<[1], [0], [0], [1], [0, 0, 1, 1], [], []>} : vector<2x64xf32>, vector<64x256xf32>, vector<2x256xf32> -> vector<2x256xf32>
    %39 = arith.addf %37, %38 : vector<2x256xf32>
    %40 = math.tanh %39 : vector<2x256xf32>
    %41 = vector.extract_strided_slice %40 {offsets = [0, 0], sizes = [2, 192], strides = [1, 1]} : vector<2x256xf32> to vector<2x192xf32>
    %cst_12 = arith.constant 5.000000e-01 : f32
    %42 = vector.broadcast %cst_12 : f32 to vector<2x192xf32>
    %43 = arith.mulf %42, %41 : vector<2x192xf32>
    %cst_13 = arith.constant 5.000000e-01 : f32
    %44 = vector.broadcast %cst_13 : f32 to vector<2x192xf32>
    %45 = arith.addf %43, %44 : vector<2x192xf32>
    %46 = vector.extract_strided_slice %45 {offsets = [0, 0], sizes = [2, 64], strides = [1, 1]} : vector<2x192xf32> to vector<2x64xf32>
    %47 = vector.extract_strided_slice %45 {offsets = [0, 64], sizes = [2, 64], strides = [1, 1]} : vector<2x192xf32> to vector<2x64xf32>
    %48 = vector.extract_strided_slice %45 {offsets = [0, 128], sizes = [2, 64], strides = [1, 1]} : vector<2x192xf32> to vector<2x64xf32>
    %49 = vector.extract_strided_slice %40 {offsets = [0, 192], sizes = [2, 64], strides = [1, 1]} : vector<2x256xf32> to vector<2x64xf32>
    %50 = arith.mulf %47, %35 : vector<2x64xf32>
    %51 = arith.mulf %46, %49 : vector<2x64xf32>
    %52 = arith.addf %50, %51 : vector<2x64xf32>
    %53 = math.tanh %52 : vector<2x64xf32>
    %54 = arith.mulf %48, %53 : vector<2x64xf32>
    %55 = vector.extract_strided_slice %8 {offsets = [2, 0, 0], sizes = [1, 2, 256], strides = [1, 1, 1]} : vector<8x2x256xf32> to vector<1x2x256xf32>
    %56 = vector.shape_cast %55 : vector<1x2x256xf32> to vector<2x256xf32>
    %cst_14 = arith.constant dense<0.000000e+00> : vector<2x256xf32>
    %57 = tpu.matmul %54, %0, %cst_14 {dimension_numbers = #tpu.dot_dimension_numbers<[1], [0], [0], [1], [0, 0, 1, 1], [], []>} : vector<2x64xf32>, vector<64x256xf32>, vector<2x256xf32> -> vector<2x256xf32>
    %58 = arith.addf %56, %57 : vector<2x256xf32>
    %59 = math.tanh %58 : vector<2x256xf32>
    %60 = vector.extract_strided_slice %59 {offsets = [0, 0], sizes = [2, 192], strides = [1, 1]} : vector<2x256xf32> to vector<2x192xf32>
    %cst_15 = arith.constant 5.000000e-01 : f32
    %61 = vector.broadcast %cst_15 : f32 to vector<2x192xf32>
    %62 = arith.mulf %61, %60 : vector<2x192xf32>
    %cst_16 = arith.constant 5.000000e-01 : f32
    %63 = vector.broadcast %cst_16 : f32 to vector<2x192xf32>
    %64 = arith.addf %62, %63 : vector<2x192xf32>
    %65 = vector.extract_strided_slice %64 {offsets = [0, 0], sizes = [2, 64], strides = [1, 1]} : vector<2x192xf32> to vector<2x64xf32>
    %66 = vector.extract_strided_slice %64 {offsets = [0, 64], sizes = [2, 64], strides = [1, 1]} : vector<2x192xf32> to vector<2x64xf32>
    %67 = vector.extract_strided_slice %64 {offsets = [0, 128], sizes = [2, 64], strides = [1, 1]} : vector<2x192xf32> to vector<2x64xf32>
    %68 = vector.extract_strided_slice %59 {offsets = [0, 192], sizes = [2, 64], strides = [1, 1]} : vector<2x256xf32> to vector<2x64xf32>
    %69 = arith.mulf %66, %52 : vector<2x64xf32>
    %70 = arith.mulf %65, %68 : vector<2x64xf32>
    %71 = arith.addf %69, %70 : vector<2x64xf32>
    %72 = math.tanh %71 : vector<2x64xf32>
    %73 = arith.mulf %67, %72 : vector<2x64xf32>
    %74 = vector.extract_strided_slice %8 {offsets = [3, 0, 0], sizes = [1, 2, 256], strides = [1, 1, 1]} : vector<8x2x256xf32> to vector<1x2x256xf32>
    %75 = vector.shape_cast %74 : vector<1x2x256xf32> to vector<2x256xf32>
    %cst_17 = arith.constant dense<0.000000e+00> : vector<2x256xf32>
    %76 = tpu.matmul %73, %0, %cst_17 {dimension_numbers = #tpu.dot_dimension_numbers<[1], [0], [0], [1], [0, 0, 1, 1], [], []>} : vector<2x64xf32>, vector<64x256xf32>, vector<2x256xf32> -> vector<2x256xf32>
    %77 = arith.addf %75, %76 : vector<2x256xf32>
    %78 = math.tanh %77 : vector<2x256xf32>
    %79 = vector.extract_strided_slice %78 {offsets = [0, 0], sizes = [2, 192], strides = [1, 1]} : vector<2x256xf32> to vector<2x192xf32>
    %cst_18 = arith.constant 5.000000e-01 : f32
    %80 = vector.broadcast %cst_18 : f32 to vector<2x192xf32>
    %81 = arith.mulf %80, %79 : vector<2x192xf32>
    %cst_19 = arith.constant 5.000000e-01 : f32
    %82 = vector.broadcast %cst_19 : f32 to vector<2x192xf32>
    %83 = arith.addf %81, %82 : vector<2x192xf32>
    %84 = vector.extract_strided_slice %83 {offsets = [0, 0], sizes = [2, 64], strides = [1, 1]} : vector<2x192xf32> to vector<2x64xf32>
    %85 = vector.extract_strided_slice %83 {offsets = [0, 64], sizes = [2, 64], strides = [1, 1]} : vector<2x192xf32> to vector<2x64xf32>
    %86 = vector.extract_strided_slice %83 {offsets = [0, 128], sizes = [2, 64], strides = [1, 1]} : vector<2x192xf32> to vector<2x64xf32>
    %87 = vector.extract_strided_slice %78 {offsets = [0, 192], sizes = [2, 64], strides = [1, 1]} : vector<2x256xf32> to vector<2x64xf32>
    %88 = arith.mulf %85, %71 : vector<2x64xf32>
    %89 = arith.mulf %84, %87 : vector<2x64xf32>
    %90 = arith.addf %88, %89 : vector<2x64xf32>
    %91 = math.tanh %90 : vector<2x64xf32>
    %92 = arith.mulf %86, %91 : vector<2x64xf32>
    %93 = vector.extract_strided_slice %8 {offsets = [4, 0, 0], sizes = [1, 2, 256], strides = [1, 1, 1]} : vector<8x2x256xf32> to vector<1x2x256xf32>
    %94 = vector.shape_cast %93 : vector<1x2x256xf32> to vector<2x256xf32>
    %cst_20 = arith.constant dense<0.000000e+00> : vector<2x256xf32>
    %95 = tpu.matmul %92, %0, %cst_20 {dimension_numbers = #tpu.dot_dimension_numbers<[1], [0], [0], [1], [0, 0, 1, 1], [], []>} : vector<2x64xf32>, vector<64x256xf32>, vector<2x256xf32> -> vector<2x256xf32>
    %96 = arith.addf %94, %95 : vector<2x256xf32>
    %97 = math.tanh %96 : vector<2x256xf32>
    %98 = vector.extract_strided_slice %97 {offsets = [0, 0], sizes = [2, 192], strides = [1, 1]} : vector<2x256xf32> to vector<2x192xf32>
    %cst_21 = arith.constant 5.000000e-01 : f32
    %99 = vector.broadcast %cst_21 : f32 to vector<2x192xf32>
    %100 = arith.mulf %99, %98 : vector<2x192xf32>
    %cst_22 = arith.constant 5.000000e-01 : f32
    %101 = vector.broadcast %cst_22 : f32 to vector<2x192xf32>
    %102 = arith.addf %100, %101 : vector<2x192xf32>
    %103 = vector.extract_strided_slice %102 {offsets = [0, 0], sizes = [2, 64], strides = [1, 1]} : vector<2x192xf32> to vector<2x64xf32>
    %104 = vector.extract_strided_slice %102 {offsets = [0, 64], sizes = [2, 64], strides = [1, 1]} : vector<2x192xf32> to vector<2x64xf32>
    %105 = vector.extract_strided_slice %102 {offsets = [0, 128], sizes = [2, 64], strides = [1, 1]} : vector<2x192xf32> to vector<2x64xf32>
    %106 = vector.extract_strided_slice %97 {offsets = [0, 192], sizes = [2, 64], strides = [1, 1]} : vector<2x256xf32> to vector<2x64xf32>
    %107 = arith.mulf %104, %90 : vector<2x64xf32>
    %108 = arith.mulf %103, %106 : vector<2x64xf32>
    %109 = arith.addf %107, %108 : vector<2x64xf32>
    %110 = math.tanh %109 : vector<2x64xf32>
    %111 = arith.mulf %105, %110 : vector<2x64xf32>
    %112 = vector.extract_strided_slice %8 {offsets = [5, 0, 0], sizes = [1, 2, 256], strides = [1, 1, 1]} : vector<8x2x256xf32> to vector<1x2x256xf32>
    %113 = vector.shape_cast %112 : vector<1x2x256xf32> to vector<2x256xf32>
    %cst_23 = arith.constant dense<0.000000e+00> : vector<2x256xf32>
    %114 = tpu.matmul %111, %0, %cst_23 {dimension_numbers = #tpu.dot_dimension_numbers<[1], [0], [0], [1], [0, 0, 1, 1], [], []>} : vector<2x64xf32>, vector<64x256xf32>, vector<2x256xf32> -> vector<2x256xf32>
    %115 = arith.addf %113, %114 : vector<2x256xf32>
    %116 = math.tanh %115 : vector<2x256xf32>
    %117 = vector.extract_strided_slice %116 {offsets = [0, 0], sizes = [2, 192], strides = [1, 1]} : vector<2x256xf32> to vector<2x192xf32>
    %cst_24 = arith.constant 5.000000e-01 : f32
    %118 = vector.broadcast %cst_24 : f32 to vector<2x192xf32>
    %119 = arith.mulf %118, %117 : vector<2x192xf32>
    %cst_25 = arith.constant 5.000000e-01 : f32
    %120 = vector.broadcast %cst_25 : f32 to vector<2x192xf32>
    %121 = arith.addf %119, %120 : vector<2x192xf32>
    %122 = vector.extract_strided_slice %121 {offsets = [0, 0], sizes = [2, 64], strides = [1, 1]} : vector<2x192xf32> to vector<2x64xf32>
    %123 = vector.extract_strided_slice %121 {offsets = [0, 64], sizes = [2, 64], strides = [1, 1]} : vector<2x192xf32> to vector<2x64xf32>
    %124 = vector.extract_strided_slice %121 {offsets = [0, 128], sizes = [2, 64], strides = [1, 1]} : vector<2x192xf32> to vector<2x64xf32>
    %125 = vector.extract_strided_slice %116 {offsets = [0, 192], sizes = [2, 64], strides = [1, 1]} : vector<2x256xf32> to vector<2x64xf32>
    %126 = arith.mulf %123, %109 : vector<2x64xf32>
    %127 = arith.mulf %122, %125 : vector<2x64xf32>
    %128 = arith.addf %126, %127 : vector<2x64xf32>
    %129 = math.tanh %128 : vector<2x64xf32>
    %130 = arith.mulf %124, %129 : vector<2x64xf32>
    %131 = vector.extract_strided_slice %8 {offsets = [6, 0, 0], sizes = [1, 2, 256], strides = [1, 1, 1]} : vector<8x2x256xf32> to vector<1x2x256xf32>
    %132 = vector.shape_cast %131 : vector<1x2x256xf32> to vector<2x256xf32>
    %cst_26 = arith.constant dense<0.000000e+00> : vector<2x256xf32>
    %133 = tpu.matmul %130, %0, %cst_26 {dimension_numbers = #tpu.dot_dimension_numbers<[1], [0], [0], [1], [0, 0, 1, 1], [], []>} : vector<2x64xf32>, vector<64x256xf32>, vector<2x256xf32> -> vector<2x256xf32>
    %134 = arith.addf %132, %133 : vector<2x256xf32>
    %135 = math.tanh %134 : vector<2x256xf32>
    %136 = vector.extract_strided_slice %135 {offsets = [0, 0], sizes = [2, 192], strides = [1, 1]} : vector<2x256xf32> to vector<2x192xf32>
    %cst_27 = arith.constant 5.000000e-01 : f32
    %137 = vector.broadcast %cst_27 : f32 to vector<2x192xf32>
    %138 = arith.mulf %137, %136 : vector<2x192xf32>
    %cst_28 = arith.constant 5.000000e-01 : f32
    %139 = vector.broadcast %cst_28 : f32 to vector<2x192xf32>
    %140 = arith.addf %138, %139 : vector<2x192xf32>
    %141 = vector.extract_strided_slice %140 {offsets = [0, 0], sizes = [2, 64], strides = [1, 1]} : vector<2x192xf32> to vector<2x64xf32>
    %142 = vector.extract_strided_slice %140 {offsets = [0, 64], sizes = [2, 64], strides = [1, 1]} : vector<2x192xf32> to vector<2x64xf32>
    %143 = vector.extract_strided_slice %140 {offsets = [0, 128], sizes = [2, 64], strides = [1, 1]} : vector<2x192xf32> to vector<2x64xf32>
    %144 = vector.extract_strided_slice %135 {offsets = [0, 192], sizes = [2, 64], strides = [1, 1]} : vector<2x256xf32> to vector<2x64xf32>
    %145 = arith.mulf %142, %128 : vector<2x64xf32>
    %146 = arith.mulf %141, %144 : vector<2x64xf32>
    %147 = arith.addf %145, %146 : vector<2x64xf32>
    %148 = math.tanh %147 : vector<2x64xf32>
    %149 = arith.mulf %143, %148 : vector<2x64xf32>
    %150 = vector.extract_strided_slice %8 {offsets = [7, 0, 0], sizes = [1, 2, 256], strides = [1, 1, 1]} : vector<8x2x256xf32> to vector<1x2x256xf32>
    %151 = vector.shape_cast %150 : vector<1x2x256xf32> to vector<2x256xf32>
    %cst_29 = arith.constant dense<0.000000e+00> : vector<2x256xf32>
    %152 = tpu.matmul %149, %0, %cst_29 {dimension_numbers = #tpu.dot_dimension_numbers<[1], [0], [0], [1], [0, 0, 1, 1], [], []>} : vector<2x64xf32>, vector<64x256xf32>, vector<2x256xf32> -> vector<2x256xf32>
    %153 = arith.addf %151, %152 : vector<2x256xf32>
    %154 = math.tanh %153 : vector<2x256xf32>
    %155 = vector.extract_strided_slice %154 {offsets = [0, 0], sizes = [2, 192], strides = [1, 1]} : vector<2x256xf32> to vector<2x192xf32>
    %cst_30 = arith.constant 5.000000e-01 : f32
    %156 = vector.broadcast %cst_30 : f32 to vector<2x192xf32>
    %157 = arith.mulf %156, %155 : vector<2x192xf32>
    %cst_31 = arith.constant 5.000000e-01 : f32
    %158 = vector.broadcast %cst_31 : f32 to vector<2x192xf32>
    %159 = arith.addf %157, %158 : vector<2x192xf32>
    %160 = vector.extract_strided_slice %159 {offsets = [0, 0], sizes = [2, 64], strides = [1, 1]} : vector<2x192xf32> to vector<2x64xf32>
    %161 = vector.extract_strided_slice %159 {offsets = [0, 64], sizes = [2, 64], strides = [1, 1]} : vector<2x192xf32> to vector<2x64xf32>
    %162 = vector.extract_strided_slice %159 {offsets = [0, 128], sizes = [2, 64], strides = [1, 1]} : vector<2x192xf32> to vector<2x64xf32>
    %163 = vector.extract_strided_slice %154 {offsets = [0, 192], sizes = [2, 64], strides = [1, 1]} : vector<2x256xf32> to vector<2x64xf32>
    %164 = arith.mulf %161, %147 : vector<2x64xf32>
    %165 = arith.mulf %160, %163 : vector<2x64xf32>
    %166 = arith.addf %164, %165 : vector<2x64xf32>
    %167 = math.tanh %166 : vector<2x64xf32>
    %168 = arith.mulf %162, %167 : vector<2x64xf32>
    %cst_32 = arith.constant dense<0.000000e+00> : vector<2x256xf32>
    %169 = tpu.matmul %168, %0, %cst_32 {dimension_numbers = #tpu.dot_dimension_numbers<[1], [0], [0], [1], [0, 0, 1, 1], [], []>} : vector<2x64xf32>, vector<64x256xf32>, vector<2x256xf32> -> vector<2x256xf32>
    %170 = vector.broadcast %1 : vector<1x256xf32> to vector<2x256xf32>
    %171 = arith.addf %170, %169 : vector<2x256xf32>
    %172 = math.tanh %171 : vector<2x256xf32>
    %173 = vector.extract_strided_slice %172 {offsets = [0, 0], sizes = [2, 192], strides = [1, 1]} : vector<2x256xf32> to vector<2x192xf32>
    %cst_33 = arith.constant 5.000000e-01 : f32
    %174 = vector.broadcast %cst_33 : f32 to vector<2x192xf32>
    %175 = arith.mulf %174, %173 : vector<2x192xf32>
    %cst_34 = arith.constant 5.000000e-01 : f32
    %176 = vector.broadcast %cst_34 : f32 to vector<2x192xf32>
    %177 = arith.addf %175, %176 : vector<2x192xf32>
    %178 = vector.extract_strided_slice %177 {offsets = [0, 0], sizes = [2, 64], strides = [1, 1]} : vector<2x192xf32> to vector<2x64xf32>
    %179 = vector.extract_strided_slice %177 {offsets = [0, 64], sizes = [2, 64], strides = [1, 1]} : vector<2x192xf32> to vector<2x64xf32>
    %180 = vector.extract_strided_slice %177 {offsets = [0, 128], sizes = [2, 64], strides = [1, 1]} : vector<2x192xf32> to vector<2x64xf32>
    %181 = vector.extract_strided_slice %172 {offsets = [0, 192], sizes = [2, 64], strides = [1, 1]} : vector<2x256xf32> to vector<2x64xf32>
    %182 = arith.mulf %179, %166 : vector<2x64xf32>
    %183 = arith.mulf %178, %181 : vector<2x64xf32>
    %184 = arith.addf %182, %183 : vector<2x64xf32>
    %185 = math.tanh %184 : vector<2x64xf32>
    %186 = arith.mulf %180, %185 : vector<2x64xf32>
    %187 = vector.extract_strided_slice %186 {offsets = [0, 32], sizes = [2, 32], strides = [1, 1]} : vector<2x64xf32> to vector<2x32xf32>
    %c0_35 = arith.constant 0 : index
    %c0_36 = arith.constant 0 : index
    %188 = vector.load %arg1[%c0_35, %c0_36] : memref<2x8xf32, #tpu.memory_space<vmem>>, vector<2x8xf32>
    %c0_37 = arith.constant 0 : index
    %c0_38 = arith.constant 0 : index
    %189 = vector.load %arg5[%c0_37, %c0_38] : memref<8x32xf32, #tpu.memory_space<vmem>>, vector<8x32xf32>
    %cst_39 = arith.constant dense<0.000000e+00> : vector<2x32xf32>
    %190 = tpu.matmul %188, %189, %cst_39 {dimension_numbers = #tpu.dot_dimension_numbers<[1], [0], [0], [1], [0, 0, 1, 1], [], []>} : vector<2x8xf32>, vector<8x32xf32>, vector<2x32xf32> -> vector<2x32xf32>
    %c0_40 = arith.constant 0 : index
    %c0_41 = arith.constant 0 : index
    %191 = vector.load %arg6[%c0_40, %c0_41] : memref<1x32xf32, #tpu.memory_space<vmem>>, vector<1x32xf32>
    %192 = vector.broadcast %191 : vector<1x32xf32> to vector<2x32xf32>
    %193 = arith.addf %190, %192 : vector<2x32xf32>
    %cst_42 = arith.constant 0.000000e+00 : f32
    %194 = vector.broadcast %cst_42 : f32 to vector<2x32xf32>
    %195 = arith.maximumf %193, %194 : vector<2x32xf32>
    %c0_43 = arith.constant 0 : index
    %c0_44 = arith.constant 0 : index
    %196 = vector.load %arg7[%c0_43, %c0_44] : memref<32x64xf32, #tpu.memory_space<vmem>>, vector<32x64xf32>
    %cst_45 = arith.constant dense<0.000000e+00> : vector<2x64xf32>
    %197 = tpu.matmul %187, %196, %cst_45 {dimension_numbers = #tpu.dot_dimension_numbers<[1], [0], [0], [1], [0, 0, 1, 1], [], []>} : vector<2x32xf32>, vector<32x64xf32>, vector<2x64xf32> -> vector<2x64xf32>
    %c0_46 = arith.constant 0 : index
    %c0_47 = arith.constant 0 : index
    %198 = vector.load %arg8[%c0_46, %c0_47] : memref<32x64xf32, #tpu.memory_space<vmem>>, vector<32x64xf32>
    %cst_48 = arith.constant dense<0.000000e+00> : vector<2x64xf32>
    %199 = tpu.matmul %195, %198, %cst_48 {dimension_numbers = #tpu.dot_dimension_numbers<[1], [0], [0], [1], [0, 0, 1, 1], [], []>} : vector<2x32xf32>, vector<32x64xf32>, vector<2x64xf32> -> vector<2x64xf32>
    %200 = arith.addf %197, %199 : vector<2x64xf32>
    %c0_49 = arith.constant 0 : index
    %c0_50 = arith.constant 0 : index
    %201 = vector.load %arg9[%c0_49, %c0_50] : memref<1x64xf32, #tpu.memory_space<vmem>>, vector<1x64xf32>
    %202 = vector.broadcast %201 : vector<1x64xf32> to vector<2x64xf32>
    %203 = arith.addf %200, %202 : vector<2x64xf32>
    %cst_51 = arith.constant 0.000000e+00 : f32
    %204 = vector.broadcast %cst_51 : f32 to vector<2x64xf32>
    %205 = arith.maximumf %203, %204 : vector<2x64xf32>
    %c0_52 = arith.constant 0 : index
    %c0_53 = arith.constant 0 : index
    %206 = vector.load %arg10[%c0_52, %c0_53] : memref<64x4xf32, #tpu.memory_space<vmem>>, vector<64x4xf32>
    %cst_54 = arith.constant dense<0.000000e+00> : vector<2x4xf32>
    %207 = tpu.matmul %205, %206, %cst_54 {dimension_numbers = #tpu.dot_dimension_numbers<[1], [0], [0], [1], [0, 0, 1, 1], [], []>} : vector<2x64xf32>, vector<64x4xf32>, vector<2x4xf32> -> vector<2x4xf32>
    %c0_55 = arith.constant 0 : index
    %c0_56 = arith.constant 0 : index
    %208 = vector.load %arg11[%c0_55, %c0_56] : memref<1x4xf32, #tpu.memory_space<vmem>>, vector<1x4xf32>
    %209 = vector.broadcast %208 : vector<1x4xf32> to vector<2x4xf32>
    %210 = arith.addf %207, %209 : vector<2x4xf32>
    %c0_57 = arith.constant 0 : index
    %c0_58 = arith.constant 0 : index
    %211 = vector.load %arg12[%c0_57, %c0_58] : memref<2x4xf32, #tpu.memory_space<vmem>>, vector<2x4xf32>
    tpu.vector_store %arg12[%c0_57, %c0_58], %210 {strides = array<i32>} : memref<2x4xf32, #tpu.memory_space<vmem>>, vector<2x4xf32>,
    return
  }
}

</mosaic_0001>

<bundles_post_ra>
// kernel: tpu_custom_call.1
= control target key start
LH: loop header
LB: loop body
LE: loop exit
PB: predicated region body
PF: predicated region fallthrough
CT: control target
= control target key end

     0   :  { %17 = vsyncpa [#allocation3], 0  ;;  %s1654_s0 = inlined_call_operand.hbm [shape: f32[8,2,16], index: 0, kind: input, shape index: {}]   ;;  %s1655_s1 = inlined_call_operand.vmem [shape: f32[2,8], index: 1, kind: input, shape index: {}]   ;;  %s1656_s2 = inlined_call_operand.vmem [shape: f32[16,256], index: 2, kind: input, shape index: {}]   ;;  %s1657_s3 = inlined_call_operand.vmem [shape: f32[1,256], index: 3, kind: input, shape index: {}]   ;;  %s1658_s4 = inlined_call_operand.hbm [shape: f32[64,256], index: 4, kind: input, shape index: {}]   ;;  %s1659_s5 = inlined_call_operand.hbm [shape: f32[8,32], index: 5, kind: input, shape index: {}]   ;;  %s1660_s6 = inlined_call_operand.vmem [shape: f32[1,32], index: 6, kind: input, shape index: {}]   ;;  %s1661_s7 = inlined_call_operand.vmem [shape: f32[32,64], index: 7, kind: input, shape index: {}]   ;;  %s1662_s8 = inlined_call_operand.hbm [shape: f32[32,64], index: 8, kind: input, shape index: {}]   ;;  %s1663_s9 = inlined_call_operand.vmem [shape: f32[1,64], index: 9, kind: input, shape index: {}]   ;;  %s1664_s10 = inlined_call_operand.vmem [shape: f32[64,4], index: 10, kind: input, shape index: {}]   ;;  %s1665_s11 = inlined_call_operand.vmem [shape: f32[1,4], index: 11, kind: input, shape index: {}]   ;;  %s1666_s12 = inlined_call_operand.hbm [shape: f32[2,4], index: 12, kind: output, shape index: {}]  }
   0x1   :  { %18 = vsyncpa [#allocation6], 0 }
   0x2   :  { %19 = vsyncpa [#allocation9], 0  ;;  %s44_s23 = sshll.u32 %s1658_s4, 4  ;;  %s45_s23 = int_to_ptr.hbm [resolvable:$true] %s44_s23 }
   0x3   :  { %20 = vsyncpa [#allocation4], 0  ;;  %s1218_s24 = smov [#allocation5]   ;;  %s25_s28 = sshll.u32 %s1654_s0, 4  ;;  %s26_s28 = int_to_ptr.hbm [resolvable:$true] %s25_s28 }
   0x4   :  { %s46_s25 = sshll.u32 %s1218_s24, 4  ;;  %s1219_s29 = smov 256   ;;  %s47_s25 = int_to_ptr.vmem [resolvable:$true] %s46_s25 }
   0x5   :  { %s1220_s30 = smov 16   ;;  %s1221_s13 = smov [#allocation2]  }
   0x6   :  { %52 = dma.hbm_to_vmem [thread:$0]  %s45_s23, 2048, %s47_s25, [#allocation6], %s1219_s29, %s1219_s29, %s1220_s30  }
   0x7   :  { %s27_s14 = sshll.u32 %s1221_s13, 4  ;;  %s1222_s15 = smov 32   ;;  %s28_s14 = int_to_ptr.vmem [resolvable:$true] %s27_s14 }
   0x8   :  { %s1223_s16 = smov 2   ;;  %s58_s18 = sshll.u32 %s1659_s5, 4  ;;  %s59_s18 = int_to_ptr.hbm [resolvable:$true] %s58_s18 }
   0x9   :  { %33 = dma.hbm_to_vmem [thread:$0]  %s26_s28, 256, %s28_s14, [#allocation3], %s1222_s15, %s1222_s15, %s1223_s16  }
   0xa   :  { %s1224_s19 = smov [#allocation7]   ;;  %s72_s22 = sshll.u32 %s1662_s8, 4  ;;  %s73_s22 = int_to_ptr.hbm [resolvable:$true] %s72_s22 }
   0xb   :  { %s60_s20 = sshll.u32 %s1224_s19, 4  ;;  %s1225_s23 = smov [#allocation8]   ;;  %s61_s20 = int_to_ptr.vmem [resolvable:$true] %s60_s20 }
   0xc   :  { %63 = dma.hbm_to_vmem [thread:$0]  %s59_s18, 128, %s61_s20, [#allocation6]  }
   0xd   :  { %s74_s24 = sshll.u32 %s1225_s23, 4  ;;  %s1226_s25 = smov 128   ;;  %s75_s24 = int_to_ptr.vmem [resolvable:$true] %s74_s24 }
   0xe   :  { %s1227_s26 = smov 8  }
   0xf   :  { %80 = dma.hbm_to_vmem [thread:$0]  %s73_s22, 512, %s75_s24, [#allocation9], %s1226_s25, %s1226_s25, %s1227_s26  }
  0x10   :  { %1210 = dma.done.wait [#allocation3], 256  }
  0x11   :  { %1211 = vsyncadd [#allocation3], 4294967040 }
  0x12   :  { %1212 = dma.done.wait [#allocation6], 2176  }
  0x13   :  { %1213 = vsyncadd [#allocation6], 4294965120 }
  0x14   :  { %1214 = dma.done.wait [#allocation9], 512  }
  0x15   :  { %1215 = vsyncadd [#allocation9], 4294966784  ;;  %v131_v0 = vld [vmem:[%s1656_s2 + $0x18] sm:$0xff]  ;;  %v129_v1 = vld [vmem:[%s1656_s2 + $0x8] sm:$0xff]  ;;  %vm162_vm0 = vcmask 130048   ;;  %vm219_vm1 = vcmask 1041408   ;;  %v245_v22 = vlaneseq }
  0x16   :  { %v120_v2 = vld [vmem:[#allocation2] sm:$0x3]  ;;  %204 = vmatpush.msra.mxu2 %v131_v0  ;;  %v121_v3 = vld [vmem:[#allocation2 + $0x2] sm:$0x3]  ;;  %v122_v4 = vld [vmem:[#allocation2 + $0x4] sm:$0x3] }
  0x17   :  { %v123_v5 = vld [vmem:[#allocation2 + $0x6] sm:$0x3]  ;;  %145 = vst [vmem:[#allocation1] ss:$4 sm:$0xff] %v120_v2  ;;  %v130_v6 = vld [vmem:[%s1656_s2 + $0x10] sm:$0xff]  ;;  %v128_v7 = vld [vmem:[%s1656_s2] sm:$0xff] }
  0x18   :  { %205 = vmatpush.msra.mxu2 %v129_v1  ;;  %147 = vst [vmem:[#allocation1 + $0x1] ss:$4 sm:$0xff] %v121_v3  ;;  %181 = vmatpush.msra.mxu0 %v130_v6  ;;  %v119_v9 = vld [vmem:[%s1657_s3] sm:$0x3]  ;;  %vm221_vm2 = vcmask 1043458   ;;  %vm224_vm3 = vcmask 1045508  }
  0x19   :  { %149 = vst [vmem:[#allocation1 + $0x2] ss:$4 sm:$0xff] %v122_v4  ;;  %v1326_v10 = vperm.slane %v119_v9, 1  ;;  %v1328_v11 = vperm.slane %v119_v9, 0  ;;  %vm227_vm4 = vcmask 1045504   ;;  %s1228_s2 = smov 64  }
  0x1a   :  { %151 = vst [vmem:[#allocation1 + $0x3] ss:$4 sm:$0xff] %v123_v5  ;;  %182 = vmatpush.msra.mxu0 %v128_v7  ;;  %v246_v23 = vand.u32 127, %v245_v22  ;;  %v1229_v24 = vmov 0.0   ;;  %v1351_v31 = vld [vmem:[#allocation5 + $0x70] sm:$0xff]  ;;  %v1353_v32 = vld [vmem:[#allocation5 + $0x78] sm:$0xff] }
  0x1b   :  { %v1355_v33 = vld [vmem:[#allocation5 + $0x60] sm:$0xff]  ;;  %292 = vmatpush.msrb.mxu2 %v1351_v31  ;;  %312 = vmatpush.msra.mxu3 %v1353_v32  ;;  %v1359_v34 = vld [vmem:[#allocation5 + $0x68] sm:$0xff]  ;;  %v1361_v35 = vld [vmem:[#allocation5 + $0x50] sm:$0xff]  ;;  %vm280_vm6 = vcmask 523264   ;;  %vm866_vm7 = vcmask 64512   ;;  %vm899_vm8 = vcmask 261120  }
  0x1c   :  { %vm247_vm5 = vcmp.lt.s32.totalorder %v246_v23, 32  ;;  %v1363_v36 = vld [vmem:[#allocation5 + $0x58] sm:$0xff]  ;;  %365 = vmatpush.msrb.mxu0 %v1351_v31  ;;  %385 = vmatpush.msra.mxu1 %v1353_v32  ;;  %v1369_v40 = vld [vmem:[#allocation5 + $0x40] sm:$0xff]  ;;  %v1371_v41 = vld [vmem:[#allocation5 + $0x48] sm:$0xff]  ;;  %s1230_s25 = smov 96   ;;  %s1231_s20 = smov [#allocation10]  }
  0x1d   :  { %v1343_v25 = vsel %vm247_vm5, 1.0, %v1229_v24  ;;  %v124_v37 = vld [vmem:[#allocation2 + $0x8] sm:$0x3]  ;;  %293 = vmatpush.msrb.mxu2 %v1355_v33  ;;  %313 = vmatpush.msra.mxu3 %v1359_v34  ;;  %v125_v38 = vld [vmem:[#allocation2 + $0xa] sm:$0x3]  ;;  %v1377_v43 = vld [vmem:[#allocation5 + $0x30] sm:$0xff] }
  0x1e   :  { %276 = vrot.lane.b32.xlu2 %v1343_v25, %s1228_s2  ;;  %v126_v39 = vld [vmem:[#allocation2 + $0xc] sm:$0x3]  ;;  %v127_v42 = vld [vmem:[#allocation2 + $0xe] sm:$0x3]  ;;  %153 = vst [vmem:[#allocation1 + $0x20] ss:$4 sm:$0xff] %v124_v37  ;;  %366 = vmatpush.msrb.mxu0 %v1355_v33 }
  0x1f   :  { %386 = vmatpush.msra.mxu1 %v1359_v34  ;;  %294 = vmatpush.msrb.mxu2 %v1361_v35  ;;  %155 = vst [vmem:[#allocation1 + $0x21] ss:$4 sm:$0xff] %v125_v38  ;;  %v1379_v44 = vld [vmem:[#allocation5 + $0x38] sm:$0xff]  ;;  %v1398_v50 = vld [vmem:[#allocation5 + $0x20] sm:$0xff]  ;;  %v1400_v51 = vld [vmem:[#allocation5 + $0x28] sm:$0xff]  ;;  %s996_s21 = sshll.u32 %s1231_s20, 4  ;;  %s997_s21 = int_to_ptr.vmem [resolvable:$true] %s996_s21 }
  0x20   :  { %314 = vmatpush.msra.mxu3 %v1363_v36  ;;  %157 = vst [vmem:[#allocation1 + $0x22] ss:$4 sm:$0xff] %v126_v39  ;;  %367 = vmatpush.msrb.mxu0 %v1361_v35  ;;  %v1404_v52 = vld [vmem:[#allocation5 + $0x10] sm:$0xff]  ;;  %v1406_v53 = vld [vmem:[#allocation5 + $0x18] sm:$0xff]  ;;  %v1412_v54 = vld [vmem:[#allocation5] sm:$0xff]  ;;  %s998_s22 = sshll.u32 %s1666_s12, 4  ;;  %s999_s22 = int_to_ptr.hbm [resolvable:$true] %s998_s22 }
  0x21   :  { %v160_v8 = vld.sshfl [vmem:[#allocation1] sm:$0xff pattern:$0x73625140]  ;;  %387 = vmatpush.msra.mxu1 %v1363_v36  ;;  %295 = vmatpush.msrb.mxu2 %v1369_v40  ;;  %159 = vst [vmem:[#allocation1 + $0x23] ss:$4 sm:$0xff] %v127_v42  ;;  %vm989_vm9 = vcmask 25600  }
  0x22   :  { %1012 = vmatmul.msk.f32.vlgmr.msra.gmra.mxu2 %vm162_vm0, %v160_v8  ;;  %1010 = vmatmul.msk.f32.vlgmr.msra.gmra.mxu0 %vm162_vm0, %v160_v8  ;;  %v1414_v55 = vld [vmem:[#allocation5 + $0x8] sm:$0xff] }
  0x23   :  { %315 = vmatpush.msra.mxu3 %v1371_v41  ;;  %368 = vmatpush.msrb.mxu0 %v1369_v40 }
  0x24   :  { %388 = vmatpush.msra.mxu1 %v1371_v41  ;;  %296 = vmatpush.msrb.mxu2 %v1377_v43 }
  0x25   :  { %316 = vmatpush.msra.mxu3 %v1379_v44  ;;  %369 = vmatpush.msrb.mxu0 %v1377_v43 }
  0x26   :  { %389 = vmatpush.msra.mxu1 %v1379_v44  ;;  %297 = vmatpush.msrb.mxu2 %v1398_v50 }
  0x27   :  { %317 = vmatpush.msra.mxu3 %v1400_v51  ;;  %370 = vmatpush.msrb.mxu0 %v1398_v50 }
  0x28   :  { %v161_v45 = vld.sshfl [vmem:[#allocation1 + $0x20] sm:$0xff pattern:$0x73625140]  ;;  %390 = vmatpush.msra.mxu1 %v1400_v51  ;;  %298 = vmatpush.msrb.mxu2 %v1404_v52 }
  0x29   :  { %318 = vmatpush.msra.mxu3 %v1406_v53  ;;  %371 = vmatpush.msrb.mxu0 %v1404_v52 }
  0x2a   :  { %1013 = vmatmul.msk.f32.gmra.mxu2 %vm162_vm0, %v161_v45  ;;  %1011 = vmatmul.msk.f32.gmra.mxu0 %vm162_vm0, %v161_v45 }
  0x2b   :  { %391 = vmatpush.msra.mxu1 %v1406_v53  ;;  %299 = vmatpush.msrb.mxu2 %v1412_v54 }
  0x2c   :  { %319 = vmatpush.msra.mxu3 %v1414_v55  ;;  %372 = vmatpush.msrb.mxu0 %v1412_v54 }
  0x2d   :  { %392 = vmatpush.msra.mxu1 %v1414_v55  ;;  %438 = vmatpush.msra.mxu2 %v1351_v31 }
  0x2e   :  { %458 = vmatpush.msrb.mxu3 %v1353_v32  ;;  %511 = vmatpush.msra.mxu0 %v1351_v31 }
  0x2f   :  { %531 = vmatpush.msrb.mxu1 %v1353_v32  ;;  %439 = vmatpush.msra.mxu2 %v1355_v33 }
  0x30   :  { %459 = vmatpush.msrb.mxu3 %v1359_v34  ;;  %512 = vmatpush.msra.mxu0 %v1355_v33 }
  0x31   :  { %532 = vmatpush.msrb.mxu1 %v1359_v34  ;;  %440 = vmatpush.msra.mxu2 %v1361_v35 }
  0x32   :  { %460 = vmatpush.msrb.mxu3 %v1363_v36  ;;  %513 = vmatpush.msra.mxu0 %v1361_v35 }
  0x33   :  { %533 = vmatpush.msrb.mxu1 %v1363_v36  ;;  %441 = vmatpush.msra.mxu2 %v1369_v40 }
  0x34   :  { %461 = vmatpush.msrb.mxu3 %v1371_v41  ;;  %514 = vmatpush.msra.mxu0 %v1369_v40 }
  0x35   :  { %534 = vmatpush.msrb.mxu1 %v1371_v41  ;;  %442 = vmatpush.msra.mxu2 %v1377_v43 }
  0x36   :  { %462 = vmatpush.msrb.mxu3 %v1379_v44  ;;  %515 = vmatpush.msra.mxu0 %v1377_v43 }
  0x37   :  { %535 = vmatpush.msrb.mxu1 %v1379_v44  ;;  %443 = vmatpush.msra.mxu2 %v1398_v50 }
  0x38   :  { %463 = vmatpush.msrb.mxu3 %v1400_v51  ;;  %516 = vmatpush.msra.mxu0 %v1398_v50 }
  0x39   :  { %536 = vmatpush.msrb.mxu1 %v1400_v51  ;;  %444 = vmatpush.msra.mxu2 %v1404_v52 }
  0x3a   :  { %464 = vmatpush.msrb.mxu3 %v1406_v53  ;;  %517 = vmatpush.msra.mxu0 %v1404_v52 }
  0x3b   :  { %537 = vmatpush.msrb.mxu1 %v1406_v53  ;;  %445 = vmatpush.msra.mxu2 %v1412_v54 }
  0x3c   :  { %465 = vmatpush.msrb.mxu3 %v1414_v55  ;;  %518 = vmatpush.msra.mxu0 %v1412_v54 }
  0x3d   :  { %538 = vmatpush.msrb.mxu1 %v1414_v55 }
  0x9f   :  { %v184_v12 = vpop.f32.mrf.mxu0 }
  0xa0   :  { %v185_v15 = vadd.f32 %v184_v12, %v1328_v11 }
  0xa5   :  { %v207_v13 = vpop.f32.mrf.mxu2 }
  0xa6   :  { %v208_v14 = vadd.f32 %v207_v13, %v1326_v10 }
  0xa7   :  { %v187_v62 = vpop.f32.mrf.mxu0 }
  0xa8   :  { %v217_v16 = vrot.slane %v208_v14, 6  ;;  %v1478_v0 = vadd.f32 %v187_v62, %v1328_v11 }
  0xaa   :  { %v220_v17 = vsel %vm219_vm1, %v185_v15, %v217_v16  ;;  %v1334_v18 = vsel %vm221_vm2, %v185_v15, %v217_v16  ;;  %v1337_v19 = vsel %vm224_vm3, %v185_v15, %v217_v16  ;;  %v1340_v20 = vsel %vm227_vm4, %v217_v16, %v185_v15 }
  0xab   :  { %1052 = vtanh.f32 %v220_v17  ;;  %v223_v7 = vrot.slane %v1334_v18, 2  ;;  %v226_v38 = vrot.slane %v1337_v19, 4 }
  0xad   :  { %v210_v60 = vpop.f32.mrf.mxu2 }
  0xae   :  { %v211_v61 = vadd.f32 %v210_v60, %v1326_v10 }
  0xb0   :  { %v1475_v63 = vrot.slane %v211_v61, 6 }
  0xb1   :  { %v1053_v21 = vpop.eup %1052 }
  0xb2   :  { %255 = vrot.lane.b32.xlu0 %v1053_v21, %s1228_s2  ;;  %v251_v26 = vmul.f32 0.5, %v1053_v21  ;;  %v1483_v1 = vsel %vm221_vm2, %v1478_v0, %v1475_v63  ;;  %v1488_v2 = vsel %vm224_vm3, %v1478_v0, %v1475_v63  ;;  %v1493_v3 = vsel %vm227_vm4, %v1475_v63, %v1478_v0  ;;  %v277_v21 = vpop.permute.xlu2 %276 }
  0xb4   :  { %v1347_v28 = vadd.f32 0.5, %v251_v26 }
  0xb6   :  { %v253_v46 = vmul.f32 0.0, %v1347_v28  ;;  %v267_v56 = vrot.slane %v1347_v28, 2 }
 0x124   :  { %v256_v27 = vpop.permute.xlu0 %255 }
 0x125   :  { %v257_v29 = vrot.slane %v256_v27, 2 }
 0x127   :  { %v259_v30 = vmul.f32 %v257_v29, %v1347_v28 }
 0x129   :  { %261 = vrot.lane.b32.xlu0 %v259_v30, %s1228_s2 }
 0x19b   :  { %v262_v47 = vpop.permute.xlu0 %261 }
 0x19c   :  { %v1394_v48 = vadd.f32 %v262_v47, %v253_v46 }
 0x19e   :  { %1054 = vtanh.f32 %v1394_v48  ;;  %v279_v22 = vmul.f32 %v277_v21, %v1394_v48 }
 0x1a4   :  { %v1055_v49 = vpop.eup %1054 }
 0x1a5   :  { %270 = vrot.lane.b32.xlu1 %v1055_v49, %s1228_s2 }
 0x217   :  { %v271_v57 = vpop.permute.xlu1 %270 }
 0x218   :  { %v273_v58 = vmul.f32 %v271_v57, %v267_v56 }
 0x21a   :  { %v274_v59 = vmul.f32 %v1343_v25, %v273_v58 }
 0x21c   :  { %1015 = vmatmul.msk.f32.vlgmr.msrb.gmra.mxu2 %vm280_vm6, %v274_v59  ;;  %1016 = vmatmul.msk.f32.vlgmr.msra.gmra.mxu3 %vm280_vm6, %v274_v59 }
 0x21d   :  { %584 = vmatpush.msrb.mxu2 %v1351_v31  ;;  %604 = vmatpush.msra.mxu3 %v1353_v32 }
 0x21f   :  { %585 = vmatpush.msrb.mxu2 %v1355_v33  ;;  %605 = vmatpush.msra.mxu3 %v1359_v34 }
 0x221   :  { %586 = vmatpush.msrb.mxu2 %v1361_v35  ;;  %606 = vmatpush.msra.mxu3 %v1363_v36 }
 0x223   :  { %587 = vmatpush.msrb.mxu2 %v1369_v40  ;;  %607 = vmatpush.msra.mxu3 %v1371_v41 }
 0x225   :  { %588 = vmatpush.msrb.mxu2 %v1377_v43  ;;  %608 = vmatpush.msra.mxu3 %v1379_v44 }
 0x227   :  { %589 = vmatpush.msrb.mxu2 %v1398_v50  ;;  %609 = vmatpush.msra.mxu3 %v1400_v51 }
 0x229   :  { %590 = vmatpush.msrb.mxu2 %v1404_v52  ;;  %610 = vmatpush.msra.mxu3 %v1406_v53 }
 0x22b   :  { %591 = vmatpush.msrb.mxu2 %v1412_v54  ;;  %611 = vmatpush.msra.mxu3 %v1414_v55 }
 0x29f   :  { %v321_v4 = vpop.f32.mrf.mxu3  ;;  %v301_v6 = vpop.f32.mrf.mxu2 }
 0x2a0   :  { %v326_v5 = vrot.slane %v321_v4, 6 }
 0x2a2   :  { %v327_v8 = vsel %vm219_vm1, %v301_v6, %v326_v5 }
 0x2a3   :  { %v329_v9 = vadd.f32 %v327_v8, %v223_v7  ;;  %v229_v7 = vrot.slane %v1340_v20, 6 }
 0x2a5   :  { %1056 = vtanh.f32 %v329_v9 }
 0x2ab   :  { %v1057_v12 = vpop.eup %1056 }
 0x2ac   :  { %335 = vrot.lane.b32.xlu1 %v1057_v12, %s1228_s2  ;;  %v331_v13 = vmul.f32 0.5, %v1057_v12 }
 0x2ae   :  { %v332_v15 = vadd.f32 0.5, %v331_v13 }
 0x2b0   :  { %v333_v23 = vmul.f32 %v332_v15, %v279_v22  ;;  %v347_v26 = vrot.slane %v332_v15, 2 }
 0x31e   :  { %v336_v14 = vpop.permute.xlu1 %335 }
 0x31f   :  { %v337_v16 = vrot.slane %v336_v14, 2 }
 0x321   :  { %v339_v17 = vmul.f32 %v337_v16, %v332_v15 }
 0x323   :  { %341 = vrot.lane.b32.xlu2 %v339_v17, %s1228_s2 }
 0x37d   :  { %v342_v24 = vpop.permute.xlu2 %341 }
 0x37e   :  { %v344_v18 = vadd.f32 %v342_v24, %v333_v23 }
 0x380   :  { %1058 = vtanh.f32 %v344_v18 }
 0x386   :  { %v1059_v25 = vpop.eup %1058 }
 0x387   :  { %350 = vrot.lane.b32.xlu0 %v1059_v25, %s1228_s2 }
 0x3f9   :  { %v351_v27 = vpop.permute.xlu0 %350 }
 0x3fa   :  { %v353_v28 = vmul.f32 %v351_v27, %v347_v26 }
 0x3fc   :  { %1017 = vmatmul.msk.f32.vlgmr.msrb.gmra.mxu0 %vm280_vm6, %v353_v28  ;;  %1018 = vmatmul.msk.f32.vlgmr.msra.gmra.mxu1 %vm280_vm6, %v353_v28 }
 0x3fd   :  { %657 = vmatpush.msrb.mxu0 %v1351_v31  ;;  %677 = vmatpush.msra.mxu1 %v1353_v32 }
 0x3ff   :  { %658 = vmatpush.msrb.mxu0 %v1355_v33  ;;  %678 = vmatpush.msra.mxu1 %v1359_v34 }
 0x401   :  { %659 = vmatpush.msrb.mxu0 %v1361_v35  ;;  %679 = vmatpush.msra.mxu1 %v1363_v36 }
 0x403   :  { %660 = vmatpush.msrb.mxu0 %v1369_v40  ;;  %680 = vmatpush.msra.mxu1 %v1371_v41 }
 0x405   :  { %661 = vmatpush.msrb.mxu0 %v1377_v43  ;;  %681 = vmatpush.msra.mxu1 %v1379_v44 }
 0x407   :  { %662 = vmatpush.msrb.mxu0 %v1398_v50  ;;  %682 = vmatpush.msra.mxu1 %v1400_v51 }
 0x409   :  { %663 = vmatpush.msrb.mxu0 %v1404_v52  ;;  %683 = vmatpush.msra.mxu1 %v1406_v53 }
 0x40b   :  { %664 = vmatpush.msrb.mxu0 %v1412_v54  ;;  %684 = vmatpush.msra.mxu1 %v1414_v55 }
 0x479   :  { %v394_v29 = vpop.f32.mrf.mxu1  ;;  %v374_v37 = vpop.f32.mrf.mxu0 }
 0x47a   :  { %v399_v30 = vrot.slane %v394_v29, 6 }
 0x47c   :  { %v400_v39 = vsel %vm219_vm1, %v374_v37, %v399_v30  ;;  %v232_v30 = vrot.slane %v1483_v1, 2 }
 0x47d   :  { %v402_v42 = vadd.f32 %v400_v39, %v226_v38 }
 0x47f   :  { %1060 = vtanh.f32 %v402_v42 }
 0x485   :  { %v1061_v45 = vpop.eup %1060 }
 0x486   :  { %408 = vrot.lane.b32.xlu1 %v1061_v45, %s1228_s2  ;;  %v404_v46 = vmul.f32 0.5, %v1061_v45 }
 0x488   :  { %v405_v48 = vadd.f32 0.5, %v404_v46 }
 0x48a   :  { %v406_v57 = vmul.f32 %v405_v48, %v344_v18  ;;  %v420_v19 = vrot.slane %v405_v48, 2 }
 0x4f8   :  { %v409_v47 = vpop.permute.xlu1 %408 }
 0x4f9   :  { %v410_v49 = vrot.slane %v409_v47, 2 }
 0x4fb   :  { %v412_v56 = vmul.f32 %v410_v49, %v405_v48 }
 0x4fd   :  { %414 = vrot.lane.b32.xlu2 %v412_v56, %s1228_s2 }
 0x557   :  { %v415_v58 = vpop.permute.xlu2 %414 }
 0x558   :  { %v417_v59 = vadd.f32 %v415_v58, %v406_v57 }
 0x55a   :  { %1062 = vtanh.f32 %v417_v59 }
 0x560   :  { %v1063_v60 = vpop.eup %1062 }
 0x561   :  { %423 = vrot.lane.b32.xlu0 %v1063_v60, %s1228_s2 }
 0x5d3   :  { %v424_v61 = vpop.permute.xlu0 %423 }
 0x5d4   :  { %v426_v62 = vmul.f32 %v424_v61, %v420_v19 }
 0x5d6   :  { %1019 = vmatmul.msk.f32.vlgmr.msra.gmra.mxu2 %vm280_vm6, %v426_v62  ;;  %1020 = vmatmul.msk.f32.vlgmr.msrb.gmra.mxu3 %vm280_vm6, %v426_v62 }
 0x5d7   :  { %730 = vmatpush.msra.mxu2 %v1351_v31  ;;  %750 = vmatpush.msrb.mxu3 %v1353_v32 }
 0x5d9   :  { %731 = vmatpush.msra.mxu2 %v1355_v33  ;;  %751 = vmatpush.msrb.mxu3 %v1359_v34 }
 0x5db   :  { %732 = vmatpush.msra.mxu2 %v1361_v35  ;;  %752 = vmatpush.msrb.mxu3 %v1363_v36 }
 0x5dd   :  { %733 = vmatpush.msra.mxu2 %v1369_v40  ;;  %753 = vmatpush.msrb.mxu3 %v1371_v41 }
 0x5df   :  { %734 = vmatpush.msra.mxu2 %v1377_v43  ;;  %754 = vmatpush.msrb.mxu3 %v1379_v44 }
 0x5e1   :  { %735 = vmatpush.msra.mxu2 %v1398_v50  ;;  %755 = vmatpush.msrb.mxu3 %v1400_v51 }
 0x5e3   :  { %736 = vmatpush.msra.mxu2 %v1404_v52  ;;  %756 = vmatpush.msrb.mxu3 %v1406_v53 }
 0x5e5   :  { %737 = vmatpush.msra.mxu2 %v1412_v54  ;;  %757 = vmatpush.msrb.mxu3 %v1414_v55 }
 0x659   :  { %v467_v4 = vpop.f32.mrf.mxu3  ;;  %v447_v6 = vpop.f32.mrf.mxu2 }
 0x65a   :  { %v472_v5 = vrot.slane %v467_v4, 6  ;;  %v234_v4 = vrot.slane %v1488_v2, 4 }
 0x65c   :  { %v473_v8 = vsel %vm219_vm1, %v447_v6, %v472_v5 }
 0x65d   :  { %v475_v9 = vadd.f32 %v473_v8, %v229_v7 }
 0x65f   :  { %1064 = vtanh.f32 %v475_v9 }
 0x665   :  { %v1065_v12 = vpop.eup %1064 }
 0x666   :  { %481 = vrot.lane.b32.xlu1 %v1065_v12, %s1228_s2  ;;  %v477_v13 = vmul.f32 0.5, %v1065_v12 }
 0x668   :  { %v478_v15 = vadd.f32 0.5, %v477_v13 }
 0x66a   :  { %v479_v21 = vmul.f32 %v478_v15, %v417_v59  ;;  %v493_v20 = vrot.slane %v478_v15, 2 }
 0x6d8   :  { %v482_v14 = vpop.permute.xlu1 %481 }
 0x6d9   :  { %v483_v16 = vrot.slane %v482_v14, 2 }
 0x6db   :  { %v485_v17 = vmul.f32 %v483_v16, %v478_v15 }
 0x6dd   :  { %487 = vrot.lane.b32.xlu2 %v485_v17, %s1228_s2 }
 0x737   :  { %v488_v22 = vpop.permute.xlu2 %487 }
 0x738   :  { %v490_v23 = vadd.f32 %v488_v22, %v479_v21 }
 0x73a   :  { %1066 = vtanh.f32 %v490_v23 }
 0x740   :  { %v1067_v24 = vpop.eup %1066 }
 0x741   :  { %496 = vrot.lane.b32.xlu0 %v1067_v24, %s1228_s2 }
 0x7b3   :  { %v497_v18 = vpop.permute.xlu0 %496 }
 0x7b4   :  { %v499_v25 = vmul.f32 %v497_v18, %v493_v20 }
 0x7b6   :  { %1021 = vmatmul.msk.f32.vlgmr.msra.gmra.mxu0 %vm280_vm6, %v499_v25  ;;  %1022 = vmatmul.msk.f32.vlgmr.msrb.gmra.mxu1 %vm280_vm6, %v499_v25  ;;  %v236_v25 = vrot.slane %v1493_v3, 6 }
 0x7b7   :  { %803 = vmatpush.msra.mxu0 %v1351_v31  ;;  %823 = vmatpush.msrb.mxu1 %v1353_v32 }
 0x7b9   :  { %804 = vmatpush.msra.mxu0 %v1355_v33  ;;  %824 = vmatpush.msrb.mxu1 %v1359_v34  ;;  %v230_v34 = vsel %vm219_vm1, %v1478_v0, %v1475_v63 }
 0x7bb   :  { %805 = vmatpush.msra.mxu0 %v1361_v35  ;;  %825 = vmatpush.msrb.mxu1 %v1363_v36 }
 0x7bd   :  { %806 = vmatpush.msra.mxu0 %v1369_v40  ;;  %826 = vmatpush.msrb.mxu1 %v1371_v41 }
 0x7bf   :  { %807 = vmatpush.msra.mxu0 %v1377_v43  ;;  %827 = vmatpush.msrb.mxu1 %v1379_v44 }
 0x7c1   :  { %808 = vmatpush.msra.mxu0 %v1398_v50  ;;  %828 = vmatpush.msrb.mxu1 %v1400_v51 }
 0x7c3   :  { %809 = vmatpush.msra.mxu0 %v1404_v52  ;;  %829 = vmatpush.msrb.mxu1 %v1406_v53 }
 0x7c5   :  { %810 = vmatpush.msra.mxu0 %v1412_v54  ;;  %830 = vmatpush.msrb.mxu1 %v1414_v55 }
 0x833   :  { %v540_v31 = vpop.f32.mrf.mxu1  ;;  %v520_v33 = vpop.f32.mrf.mxu0 }
 0x834   :  { %v545_v32 = vrot.slane %v540_v31, 6 }
 0x836   :  { %v546_v35 = vsel %vm219_vm1, %v520_v33, %v545_v32 }
 0x837   :  { %v548_v36 = vadd.f32 %v546_v35, %v230_v34 }
 0x839   :  { %1068 = vtanh.f32 %v548_v36 }
 0x83f   :  { %v1069_v40 = vpop.eup %1068 }
 0x840   :  { %554 = vrot.lane.b32.xlu1 %v1069_v40, %s1228_s2  ;;  %v550_v41 = vmul.f32 0.5, %v1069_v40 }
 0x842   :  { %v551_v44 = vadd.f32 0.5, %v550_v41 }
 0x844   :  { %v552_v52 = vmul.f32 %v551_v44, %v490_v23  ;;  %v566_v63 = vrot.slane %v551_v44, 2 }
 0x8b2   :  { %v555_v43 = vpop.permute.xlu1 %554 }
 0x8b3   :  { %v556_v50 = vrot.slane %v555_v43, 2 }
 0x8b5   :  { %v558_v51 = vmul.f32 %v556_v50, %v551_v44 }
 0x8b7   :  { %560 = vrot.lane.b32.xlu2 %v558_v51, %s1228_s2 }
 0x911   :  { %v561_v53 = vpop.permute.xlu2 %560 }
 0x912   :  { %v563_v54 = vadd.f32 %v561_v53, %v552_v52 }
 0x914   :  { %1070 = vtanh.f32 %v563_v54 }
 0x91a   :  { %v1071_v55 = vpop.eup %1070 }
 0x91b   :  { %569 = vrot.lane.b32.xlu0 %v1071_v55, %s1228_s2 }
 0x98d   :  { %v570_v0 = vpop.permute.xlu0 %569 }
 0x98e   :  { %v572_v26 = vmul.f32 %v570_v0, %v566_v63 }
 0x990   :  { %1023 = vmatmul.msk.f32.vlgmr.msrb.gmra.mxu2 %vm280_vm6, %v572_v26  ;;  %1024 = vmatmul.msk.f32.vlgmr.msra.gmra.mxu3 %vm280_vm6, %v572_v26 }
 0xa13   :  { %v613_v27 = vpop.f32.mrf.mxu3  ;;  %v593_v29 = vpop.f32.mrf.mxu2 }
 0xa14   :  { %v618_v28 = vrot.slane %v613_v27, 6 }
 0xa16   :  { %v619_v37 = vsel %vm219_vm1, %v593_v29, %v618_v28 }
 0xa17   :  { %v621_v38 = vadd.f32 %v619_v37, %v232_v30 }
 0xa19   :  { %1072 = vtanh.f32 %v621_v38  ;;  %v861_v38 = vld [vmem:[#allocation7] sm:$0xff] }
 0xa1a   :  { %885 = vmatpush.msrb.mxu2 %v861_v38 }
 0xa1f   :  { %v1073_v39 = vpop.eup %1072 }
 0xa20   :  { %627 = vrot.lane.b32.xlu1 %v1073_v39, %s1228_s2  ;;  %v623_v42 = vmul.f32 0.5, %v1073_v39 }
 0xa22   :  { %v624_v46 = vadd.f32 0.5, %v623_v42 }
 0xa24   :  { %v625_v49 = vmul.f32 %v624_v46, %v563_v54  ;;  %v639_v1 = vrot.slane %v624_v46, 2 }
 0xa92   :  { %v628_v45 = vpop.permute.xlu1 %627 }
 0xa93   :  { %v629_v47 = vrot.slane %v628_v45, 2 }
 0xa95   :  { %v631_v48 = vmul.f32 %v629_v47, %v624_v46  ;;  %v898_v46 = vld [vmem:[#allocation8 + $0x18] sm:$0xff]  ;;  %v897_v47 = vld [vmem:[#allocation8 + $0x10] sm:$0xff] }
 0xa96   :  { %915 = vmatpush.msra.mxu3 %v898_v46 }
 0xa97   :  { %633 = vrot.lane.b32.xlu2 %v631_v48, %s1228_s2  ;;  %v894_v48 = vld [vmem:[%s1661_s7 + $0x18] sm:$0xff] }
 0xa98   :  { %916 = vmatpush.msra.mxu3 %v897_v47 }
 0xaf1   :  { %v634_v56 = vpop.permute.xlu2 %633 }
 0xaf2   :  { %v636_v57 = vadd.f32 %v634_v56, %v625_v49  ;;  %v896_v49 = vld [vmem:[#allocation8 + $0x8] sm:$0xff]  ;;  %v893_v56 = vld [vmem:[%s1661_s7 + $0x10] sm:$0xff] }
 0xaf3   :  { %917 = vmatpush.msra.mxu3 %v896_v49 }
 0xaf4   :  { %1074 = vtanh.f32 %v636_v57 }
 0xafa   :  { %v1075_v58 = vpop.eup %1074 }
 0xafb   :  { %642 = vrot.lane.b32.xlu0 %v1075_v58, %s1228_s2  ;;  %v895_v58 = vld [vmem:[#allocation8] sm:$0xff] }
 0xafc   :  { %918 = vmatpush.msra.mxu3 %v895_v58 }
 0xb6d   :  { %v643_v59 = vpop.permute.xlu0 %642 }
 0xb6e   :  { %v645_v60 = vmul.f32 %v643_v59, %v639_v1  ;;  %v891_v1 = vld [vmem:[%s1661_s7] sm:$0xff] }
 0xb6f   :  { %v1049_v59 = vld [vmem:[%s1660_s6] ss:$0 sm:$0xff] }
 0xb70   :  { %1025 = vmatmul.msk.f32.vlgmr.msrb.gmra.mxu0 %vm280_vm6, %v645_v60  ;;  %1026 = vmatmul.msk.f32.vlgmr.msra.gmra.mxu1 %vm280_vm6, %v645_v60 }
 0xb71   :  { %940 = vmatpush.msrb.mxu0 %v894_v48 }
 0xb73   :  { %941 = vmatpush.msrb.mxu0 %v893_v56 }
 0xbed   :  { %v686_v19 = vpop.f32.mrf.mxu1  ;;  %v666_v62 = vpop.f32.mrf.mxu0 }
 0xbee   :  { %v691_v61 = vrot.slane %v686_v19, 6 }
 0xbf0   :  { %v692_v5 = vsel %vm219_vm1, %v666_v62, %v691_v61 }
 0xbf1   :  { %v694_v6 = vadd.f32 %v692_v5, %v234_v4 }
 0xbf3   :  { %1076 = vtanh.f32 %v694_v6 }
 0xbf9   :  { %v1077_v7 = vpop.eup %1076 }
 0xbfa   :  { %700 = vrot.lane.b32.xlu1 %v1077_v7, %s1228_s2  ;;  %v696_v8 = vmul.f32 0.5, %v1077_v7  ;;  %v961_v7 = vld [vmem:[%s1664_s10 + $0x38] sm:$0xff] }
 0xbfb   :  { %977 = vmatpush.msra.mxu1 %v961_v7 }
 0xbfc   :  { %v697_v12 = vadd.f32 0.5, %v696_v8  ;;  %v960_v8 = vld [vmem:[%s1664_s10 + $0x30] sm:$0xff] }
 0xbfd   :  { %978 = vmatpush.msra.mxu1 %v960_v8 }
 0xbfe   :  { %v698_v15 = vmul.f32 %v697_v12, %v636_v57  ;;  %v712_v2 = vrot.slane %v697_v12, 2  ;;  %v892_v57 = vld [vmem:[%s1661_s7 + $0x8] sm:$0xff] }
 0xbff   :  { %942 = vmatpush.msrb.mxu0 %v892_v57 }
 0xc01   :  { %943 = vmatpush.msrb.mxu0 %v891_v1 }
 0xc6c   :  { %v701_v9 = vpop.permute.xlu1 %700 }
 0xc6d   :  { %v702_v13 = vrot.slane %v701_v9, 2  ;;  %v959_v9 = vld [vmem:[%s1664_s10 + $0x28] sm:$0xff] }
 0xc6e   :  { %979 = vmatpush.msra.mxu1 %v959_v9 }
 0xc6f   :  { %v704_v14 = vmul.f32 %v702_v13, %v697_v12  ;;  %v958_v12 = vld [vmem:[%s1664_s10 + $0x20] sm:$0xff] }
 0xc70   :  { %980 = vmatpush.msra.mxu1 %v958_v12 }
 0xc71   :  { %706 = vrot.lane.b32.xlu2 %v704_v14, %s1228_s2  ;;  %v957_v14 = vld [vmem:[%s1664_s10 + $0x18] sm:$0xff] }
 0xc72   :  { %981 = vmatpush.msra.mxu1 %v957_v14 }
 0xccb   :  { %v707_v16 = vpop.permute.xlu2 %706 }
 0xccc   :  { %v709_v17 = vadd.f32 %v707_v16, %v698_v15  ;;  %v956_v15 = vld [vmem:[%s1664_s10 + $0x10] sm:$0xff]  ;;  %v955_v16 = vld [vmem:[%s1664_s10 + $0x8] sm:$0xff] }
 0xccd   :  { %982 = vmatpush.msra.mxu1 %v956_v15 }
 0xcce   :  { %1078 = vtanh.f32 %v709_v17 }
 0xccf   :  { %983 = vmatpush.msra.mxu1 %v955_v16 }
 0xcd4   :  { %v1079_v21 = vpop.eup %1078 }
 0xcd5   :  { %715 = vrot.lane.b32.xlu0 %v1079_v21, %s1228_s2 }
 0xd47   :  { %v716_v22 = vpop.permute.xlu0 %715 }
 0xd48   :  { %v718_v23 = vmul.f32 %v716_v22, %v712_v2  ;;  %v1050_v2 = vld [vmem:[%s1663_s9] ss:$0 sm:$0xff] }
 0xd4a   :  { %1027 = vmatmul.msk.f32.vlgmr.msra.gmra.mxu2 %vm280_vm6, %v718_v23  ;;  %1028 = vmatmul.msk.f32.vlgmr.msrb.gmra.mxu3 %vm280_vm6, %v718_v23 }
 0xdcd   :  { %v759_v24 = vpop.f32.mrf.mxu3  ;;  %v739_v18 = vpop.f32.mrf.mxu2 }
 0xdce   :  { %v764_v20 = vrot.slane %v759_v24, 6 }
 0xdd0   :  { %v765_v31 = vsel %vm219_vm1, %v739_v18, %v764_v20  ;;  %v1051_v18 = vld [vmem:[%s1665_s11] ss:$0 sm:$0xff] }
 0xdd1   :  { %v767_v32 = vadd.f32 %v765_v31, %v236_v25 }
 0xdd3   :  { %1080 = vtanh.f32 %v767_v32 }
 0xdd9   :  { %v1081_v33 = vpop.eup %1080 }
 0xdda   :  { %773 = vrot.lane.b32.xlu1 %v1081_v33, %s1228_s2  ;;  %v769_v34 = vmul.f32 0.5, %v1081_v33 }
 0xddc   :  { %v770_v36 = vadd.f32 0.5, %v769_v34 }
 0xdde   :  { %v771_v43 = vmul.f32 %v770_v36, %v709_v17  ;;  %v785_v3 = vrot.slane %v770_v36, 2  ;;  %v954_v17 = vld [vmem:[%s1664_s10] sm:$0xff] }
 0xddf   :  { %984 = vmatpush.msra.mxu1 %v954_v17 }
 0xe4c   :  { %v774_v35 = vpop.permute.xlu1 %773 }
 0xe4d   :  { %v775_v40 = vrot.slane %v774_v35, 2 }
 0xe4f   :  { %v777_v41 = vmul.f32 %v775_v40, %v770_v36 }
 0xe51   :  { %779 = vrot.lane.b32.xlu2 %v777_v41, %s1228_s2 }
 0xeab   :  { %v780_v44 = vpop.permute.xlu2 %779 }
 0xeac   :  { %v782_v50 = vadd.f32 %v780_v44, %v771_v43 }
 0xeae   :  { %1082 = vtanh.f32 %v782_v50 }
 0xeb4   :  { %v1083_v51 = vpop.eup %1082 }
 0xeb5   :  { %788 = vrot.lane.b32.xlu0 %v1083_v51, %s1228_s2 }
 0xf27   :  { %v789_v52 = vpop.permute.xlu0 %788 }
 0xf28   :  { %v791_v53 = vmul.f32 %v789_v52, %v785_v3 }
 0xf2a   :  { %1029 = vmatmul.msk.f32.vlgmr.msra.gmra.mxu0 %vm280_vm6, %v791_v53  ;;  %1030 = vmatmul.msk.f32.vlgmr.msrb.gmra.mxu1 %vm280_vm6, %v791_v53 }
 0xfa7   :  { %v832_v54 = vpop.f32.mrf.mxu1  ;;  %v812_v0 = vpop.f32.mrf.mxu0 }
 0xfa8   :  { %v836_v55 = vadd.f32 %v832_v54, %v1326_v10  ;;  %v835_v26 = vadd.f32 %v812_v0, %v1328_v11  ;;  %v860_v10 = vld [vmem:[%s1655_s1] sm:$0x3] }
 0xfa9   :  { %1031 = vmatmul.msk.f32.vlgmr.msrb.gmra.mxu2 %vm866_vm7, %v860_v10 }
 0xfaa   :  { %1084 = vtanh.f32 %v836_v55 }
 0xfab   :  { %1086 = vtanh.f32 %v835_v26 }
 0xfb0   :  { %v1085_v63 = vpop.eup %1084 }
 0xfb1   :  { %845 = vrot.lane.b32.xlu1 %v1085_v63, %s1228_s2  ;;  %v1087_v27 = vpop.eup %1086  ;;  %v840_v62 = vmul.f32 0.5, %v1085_v63 }
 0xfb2   :  { %v839_v28 = vmul.f32 0.5, %v1087_v27 }
 0xfb3   :  { %v842_v4 = vadd.f32 0.5, %v840_v62 }
 0xfb4   :  { %v841_v29 = vadd.f32 0.5, %v839_v28 }
 0xfb6   :  { %v843_v39 = vmul.f32 %v841_v29, %v782_v50 }
0x1023   :  { %v846_v30 = vpop.permute.xlu1 %845 }
0x1024   :  { %v848_v37 = vmul.f32 %v846_v30, %v841_v29 }
0x1026   :  { %850 = vrot.lane.b32.xlu2 %v848_v37, %s1228_s2 }
0x102c   :  { %v887_v60 = vpop.f32.mrf.mxu2 }
0x102d   :  { %v888_v19 = vadd.f32 %v1049_v59, %v887_v60 }
0x102f   :  { %v890_v61 = vmax.f32 %v888_v19, 0.0 }
0x1031   :  { %1032 = vmatmul.msk.f32.vlgmr.msra.gmra.mxu3 %vm899_vm8, %v890_v61 }
0x1080   :  { %v851_v42 = vpop.permute.xlu2 %850 }
0x1081   :  { %v853_v45 = vadd.f32 %v851_v42, %v843_v39 }
0x1083   :  { %1088 = vtanh.f32 %v853_v45 }
0x1089   :  { %v1089_v11 = vpop.eup %1088 }
0x108a   :  { %856 = vrot.lane.b32.xlu0 %v1089_v11, %s1228_s2 }
0x10b4   :  { %v920_v21 = vpop.f32.mrf.mxu3 }
0x10fc   :  { %v857_v5 = vpop.permute.xlu0 %856 }
0x10fd   :  { %v859_v6 = vmul.f32 %v857_v5, %v842_v4 }
0x10ff   :  { %924 = vrot.lane.b32.xlu1 %v859_v6, %s1230_s25 }
0x1171   :  { %v925_v13 = vpop.permute.xlu1 %924 }
0x1172   :  { %1033 = vmatmul.msk.f32.vlgmr.msrb.gmra.mxu0 %vm899_vm8, %v925_v13 }
0x11ef   :  { %v945_v22 = vpop.f32.mrf.mxu0 }
0x11f0   :  { %v946_v23 = vadd.f32 %v945_v22, %v920_v21 }
0x11f2   :  { %v952_v24 = vadd.f32 %v1050_v2, %v946_v23 }
0x11f4   :  { %v953_v20 = vmax.f32 %v952_v24, 0.0 }
0x11f6   :  { %1034 = vmatmul.msk.f32.vlgmr.msra.gmra.mxu1 %vm280_vm6, %v953_v20 }
0x1273   :  { %v986_v25 = vpop.f32.mrf.mxu1 }
0x1274   :  { %v987_v31 = vadd.f32 %v1051_v18, %v986_v25 }
0x1276   :  { %990 = vst.msk [vmem:[#allocation10] sm:$0x3] %vm989_vm9, %v987_v31 }
0x1277   :  { %1001 = dma.vmem_to_hbm [thread:$0]  %s997_s21, 32, %s999_s22, [#allocation4]  }
0x1278   :  { %1216 = dma.done.wait [#allocation4], 32  }
0x1279   :  { %1217 = vsyncadd [#allocation4], 4294967264 }
0x127a   :  { %1006 = vsyncpa [#allocation3], 1 }
0x127b   :  { %1007 = vsyncpa [#allocation6], 1 }
0x127c   :  { %1008 = vsyncpa [#allocation9], 1 }
0x127d   :  { %1009 = vsyncpa [#allocation4], 1 }

</bundles_post_ra>
